<compile_context>
chip_gen: v7x
topology: tpu7x:2x2x1
jax: 0.10.0
libtpu: 0.0.40
codegen_flags: <defaults>
</compile_context>

<pallas_src>
import functools

import jax
import jax.numpy as jnp
import numpy as np
from jax.experimental import pallas as pl
from jax.experimental.pallas import tpu as pltpu


def _round_up(x, m):
    return ((x + m - 1) // m) * m


def _vmem_budgets():
    """(tile-planning budget, compiler vmem_limit_bytes) — generation-aware."""
    phys = None
    try:
        info = pltpu.get_tpu_info()
        for attr in ("vmem_capacity_bytes", "vmem_size_bytes", "vmem_bytes"):
            v = getattr(info, attr, None)
            if v:
                phys = int(v)
                break
    except Exception:
        phys = None
    if not phys:
        phys = 64 << 20              # conservative fallback (v7x per-TC VMEM)
    budget = int(phys * 0.75)        # ~96 MiB on v5e/v6e, ~48 MiB on v7x
    limit = int(phys * 0.85)         # ~108 MiB on v5e/v6e, ~54 MiB on v7x
    return budget, limit


def linker_kernel(x_ref, we_ref, be_ref, wf_ref, bf_ref, wd_ref, bd_ref, o_ref):
    # x_ref : (TB, Kp)    concatenated + padded view features (one batch tile)
    # we_ref: (Kp, H1p)   block-diagonal per-view encoder-FC weights (padded)
    # be_ref: (1, H1p)    concatenated encoder-FC biases (f32, padded)
    # wf_ref: (H1p, H2p)  fuse-FC weight (padded)
    # bf_ref: (1, H2p)    fuse-FC bias (f32, padded)
    # wd_ref: (H2p, Dp)   decoder-FC weight (padded)
    # bd_ref: (1, Dp)     decoder-FC bias (f32, padded)
    # o_ref : (TB, Dp)    output tile (compute dtype; f32 accumulation inside)
    h = jnp.dot(x_ref[...], we_ref[...], preferred_element_type=jnp.float32)
    h = jnp.maximum(h + be_ref[...], 0.0)

    f = jnp.dot(h.astype(wf_ref.dtype), wf_ref[...],
                preferred_element_type=jnp.float32)
    f = jnp.maximum(f + bf_ref[...], 0.0)

    d = jnp.dot(f.astype(wd_ref.dtype), wd_ref[...],
                preferred_element_type=jnp.float32)
    d = jnp.maximum(d + bd_ref[...], 0.0)
    o_ref[...] = d.astype(o_ref.dtype)


def _choose_batch_tile(B, align, row_io_bytes, row_scratch_bytes,
                       resident_bytes, vmem_budget, cap=1024):
    """Batch tile that fits the VMEM budget, yields >=2 grid steps when the
    batch allows (v7x megacore), and balances padded rows vs per-step cost."""
    Bp0 = _round_up(max(B, 1), align)
    if Bp0 < 2 * align:
        return Bp0                                     # single small tile
    # Keep at least 2 grid steps so the "parallel" axis shards across both TCs.
    cap = min(cap, max(align, (Bp0 // 2) // align * align))
    per_row = 2 * row_io_bytes + row_scratch_bytes     # io is double-buffered
    avail = max(vmem_budget - resident_bytes, per_row * align)
    cap = min(cap, max(align, (avail // per_row) // align * align))

    # Cost model: HBM/MXU work ~ padded rows; ~0.35us per grid step expressed
    # as an equivalent number of streamed-io rows.
    step_rows = int(min(512, max(8, 350_000 // max(row_io_bytes, 1))))
    best_tb, best_cost = align, None
    tb = align
    while tb <= cap:
        bp = _round_up(Bp0, tb)
        cost = bp + (bp // tb) * step_rows
        if best_cost is None or cost < best_cost:
            best_tb, best_cost = tb, cost
        tb *= 2
    return best_tb


def prepare_linker_params(params, compute_dtype=jnp.bfloat16):
    """Fold + pad the Linker_FC_multiview parameters ONCE (host-side numpy).

    params = (wv (V,E,N), bv (V,1,N), wf (V*N,N), bf (1,N), wd (N,D), bd (1,D))
    in (in, out) layout (i.e. W^T of nn.Linear).
    """
    wv, bv, wf, bf, wd, bd = (np.asarray(p, np.float32) for p in params)
    V, E, N = wv.shape
    D = wd.shape[1]
    K, H1, H2 = V * E, V * N, N
    Kp, H1p, H2p, Dp = (_round_up(d, 128) for d in (K, H1, H2, D))

    # Block-diagonal fold of the V per-view Linears (built once, not per call):
    #   concat_v(relu(x_v @ Wv + bv)) == relu(x_cat @ W_blockdiag + b_cat)
    w_enc = np.zeros((Kp, H1p), np.float32)
    for v in range(V):
        w_enc[v * E:(v + 1) * E, v * N:(v + 1) * N] = wv[v]
    b_enc = np.zeros((1, H1p), np.float32); b_enc[0, :H1] = bv.reshape(-1)
    wf_p = np.zeros((H1p, H2p), np.float32); wf_p[:H1, :H2] = wf
    bf_p = np.zeros((1, H2p), np.float32);   bf_p[0, :H2] = bf.reshape(-1)
    wd_p = np.zeros((H2p, Dp), np.float32);  wd_p[:H2, :D] = wd
    bd_p = np.zeros((1, Dp), np.float32);    bd_p[0, :D] = bd.reshape(-1)

    return dict(
        w_enc=jnp.asarray(w_enc, compute_dtype),
        b_enc=jnp.asarray(b_enc, jnp.float32),
        wf=jnp.asarray(wf_p, compute_dtype),
        bf=jnp.asarray(bf_p, jnp.float32),
        wd=jnp.asarray(wd_p, compute_dtype),
        bd=jnp.asarray(bd_p, jnp.float32),
        dims=(V, E, N, K, D, Kp, H1p, H2p, Dp),
        compute_dtype=compute_dtype,
        out_dtype=compute_dtype,   # bf16 writeback on the bf16 path
    )


def linker_fc_multiview(view_inputs, prepared, decoder_input_nc,
                        decoder_input_shape, *, batch_tile=None):
    """Forward pass of Linker_FC_multiview via one fused Pallas MLP kernel."""
    V, E, N, K, D, Kp, H1p, H2p, Dp = prepared["dims"]
    compute_dtype = prepared["compute_dtype"]
    out_dtype = prepared["out_dtype"]
    B = view_inputs[0].shape[0]

    # ---- glue: flatten each NCHW view and concatenate -> (B, V*E) ---------
    x_cat = jnp.concatenate([v.reshape(B, -1) for v in view_inputs], axis=1)

    itemsize = np.dtype(compute_dtype).itemsize
    out_itemsize = np.dtype(out_dtype).itemsize
    # Sub-32-bit dtypes pack rows along sublanes: keep tiles 16-aligned (bf16).
    align = 8 if itemsize >= 4 else (16 if itemsize == 2 else 32)

    vmem_budget, vmem_limit = _vmem_budgets()

    weight_bytes = ((Kp * H1p + H1p * H2p + H2p * Dp) * itemsize
                    + (H1p + H2p + Dp) * 4)
    row_io = Kp * itemsize + Dp * out_itemsize         # streamed per batch row
    row_scratch = (H1p + H2p + Dp) * 4                 # f32 intermediates

    w_args = (prepared["w_enc"], prepared["b_enc"], prepared["wf"],
              prepared["bf"], prepared["wd"], prepared["bd"])

    def _run(single_buffer_weights):
        resident = weight_bytes if single_buffer_weights else 2 * weight_bytes
        if batch_tile is not None:
            TB = _round_up(batch_tile, align)
        else:
            TB = _choose_batch_tile(B, align, row_io, row_scratch,
                                    resident, vmem_budget)
        Bp = _round_up(_round_up(max(B, 1), align), TB)
        x_p = jnp.pad(x_cat, ((0, Bp - B), (0, Kp - K))).astype(compute_dtype)

        spec_kwargs = {}
        if single_buffer_weights:
            # Constant blocks (index_map == (0,0) forever): single-buffer them.
            spec_kwargs = dict(pipeline_mode=pl.Buffered(1))

        def const_spec(shape):
            return pl.BlockSpec(shape, lambda i: (0, 0), **spec_kwargs)

        cost = pl.CostEstimate(
            flops=2 * Bp * (Kp * H1p + H1p * H2p + H2p * Dp),
            transcendentals=0,
            bytes_accessed=(Bp * Kp * itemsize + weight_bytes
                            + Bp * Dp * out_itemsize),
        )

        return pl.pallas_call(
            linker_kernel,
            out_shape=jax.ShapeDtypeStruct((Bp, Dp), out_dtype),
            grid_spec=pltpu.PrefetchScalarGridSpec(
                num_scalar_prefetch=0,
                grid=(Bp // TB,),
                in_specs=[
                    pl.BlockSpec((TB, Kp), lambda i: (i, 0)),  # x tile (pipelined)
                    const_spec((Kp, H1p)),                     # VMEM-resident weights
                    const_spec((1, H1p)),
                    const_spec((H1p, H2p)),
                    const_spec((1, H2p)),
                    const_spec((H2p, Dp)),
                    const_spec((1, Dp)),
                ],
                out_specs=pl.BlockSpec((TB, Dp), lambda i: (i, 0)),
            ),
            compiler_params=pltpu.CompilerParams(
                dimension_semantics=("parallel",),
                vmem_limit_bytes=vmem_limit),
            cost_estimate=cost,
        )(x_p, *w_args)

    try:
        out = _run(True)
    except Exception:
        # Fallback for jax versions that reject pl.Buffered(1) single-buffering
        # of the constant weight blocks: use default double-buffering.
        out = _run(False)

    return out[:B, :D].reshape(B, decoder_input_nc, *decoder_input_shape)


def reference(view_inputs, params, decoder_input_nc, decoder_input_shape):
    """Plain-JAX reference identical to the PyTorch forward (f32)."""
    wv, bv, wf, bf, wd, bd = params
    B = view_inputs[0].shape[0]
    outs = [
        jnp.maximum(v.reshape(B, -1) @ wv[i] + bv[i, 0], 0.0)
        for i, v in enumerate(view_inputs)
    ]
    cat = jnp.concatenate(outs, axis=1)
    fused = jnp.maximum(cat @ wf + bf[0], 0.0)
    dec = jnp.maximum(fused @ wd + bd[0], 0.0)
    return dec.reshape(B, decoder_input_nc, *decoder_input_shape)


if __name__ == "__main__":
    # Module hyper-parameters (small, consistent with the PyTorch __init__):
    input_views_n = 2
    noise_len = 32
    encoder_out_channel = 4
    encoder_out_shape = (4, 4)
    decoder_input_shape = (4, 4, 4)
    decoder_input_nc = 2
    B = 2

    encoder_input_cell = (
        encoder_out_shape[0] * encoder_out_shape[1] * encoder_out_channel
    )
    decoder_output_cell = (
        functools.reduce(lambda a, b: a * b, decoder_input_shape) * decoder_input_nc
    )

    key = jax.random.PRNGKey(0)
    keys = jax.random.split(key, 8)

    # Deterministic synthetic parameters (in,out layout == W^T of nn.Linear).
    wv = 0.05 * jax.random.normal(
        keys[0], (input_views_n, encoder_input_cell, noise_len), jnp.float32)
    bv = 0.05 * jax.random.normal(
        keys[1], (input_views_n, 1, noise_len), jnp.float32)
    wf = 0.05 * jax.random.normal(
        keys[2], (input_views_n * noise_len, noise_len), jnp.float32)
    bf = 0.05 * jax.random.normal(keys[3], (1, noise_len), jnp.float32)
    wd = 0.05 * jax.random.normal(
        keys[4], (noise_len, decoder_output_cell), jnp.float32)
    bd = 0.05 * jax.random.normal(keys[5], (1, decoder_output_cell), jnp.float32)
    params = (wv, bv, wf, bf, wd, bd)

    # Example inputs: list of NCHW encoder feature maps, one per view.
    view_inputs = [
        jax.random.normal(
            keys[6 + i],
            (B, encoder_out_channel, encoder_out_shape[0], encoder_out_shape[1]),
            jnp.float32,
        )
        for i in range(input_views_n)
    ]

    ref = reference(view_inputs, params, decoder_input_nc, decoder_input_shape)

    # f32 path — strict check.
    prep_f32 = prepare_linker_params(params, compute_dtype=jnp.float32)
    out = linker_fc_multiview(view_inputs, prep_f32, decoder_input_nc,
                              decoder_input_shape)
    out = jax.block_until_ready(out)
    np.testing.assert_allclose(np.asarray(out), np.asarray(ref),
                               rtol=1e-5, atol=1e-5)
    assert out.shape == (B, decoder_input_nc, *decoder_input_shape)

    # bf16 path (default for v5e/v6e/v7x: bf16 MXU operands + bf16 writeback,
    # f32 accumulation inside the kernel) — loose check.
    prep_bf16 = prepare_linker_params(params, compute_dtype=jnp.bfloat16)
    out_bf16 = linker_fc_multiview(view_inputs, prep_bf16, decoder_input_nc,
                                   decoder_input_shape)
    out_bf16 = jax.block_until_ready(out_bf16)
    np.testing.assert_allclose(
        np.asarray(jnp.asarray(out_bf16, jnp.float32)), np.asarray(ref),
        rtol=5e-2, atol=5e-2)

    print("KERNEL_OK")
</pallas_src>

<mosaic_0001>
module attributes {stable_mosaic.version = 11 : i64} {
  func.func @linker_kernel(%arg0: i32, %arg1: memref<8x128xf32, #tpu.memory_space<vmem>>, %arg2: memref<128x128xf32, #tpu.memory_space<vmem>>, %arg3: memref<1x128xf32, #tpu.memory_space<vmem>>, %arg4: memref<128x128xf32, #tpu.memory_space<vmem>>, %arg5: memref<1x128xf32, #tpu.memory_space<vmem>>, %arg6: memref<128x128xf32, #tpu.memory_space<vmem>>, %arg7: memref<1x128xf32, #tpu.memory_space<vmem>>, %arg8: memref<8x128xf32, #tpu.memory_space<vmem>>) attributes {dimension_semantics = [#tpu.dimension_semantics<parallel>], iteration_bounds = array<i64: 1>, scalar_prefetch = 0 : i64, scratch_operands = 0 : i64, tpu.core_type = #tpu.core_type<tc>, window_params = [{transform_indices = @transform_0, window_bounds = array<i64: 8, 128>}, {pipeline_mode = #tpu.pipeline_mode<synchronous>, transform_indices = @transform_1, window_bounds = array<i64: 128, 128>}, {pipeline_mode = #tpu.pipeline_mode<synchronous>, transform_indices = @transform_2, window_bounds = array<i64: 1, 128>}, {pipeline_mode = #tpu.pipeline_mode<synchronous>, transform_indices = @transform_3, window_bounds = array<i64: 128, 128>}, {pipeline_mode = #tpu.pipeline_mode<synchronous>, transform_indices = @transform_4, window_bounds = array<i64: 1, 128>}, {pipeline_mode = #tpu.pipeline_mode<synchronous>, transform_indices = @transform_5, window_bounds = array<i64: 128, 128>}, {pipeline_mode = #tpu.pipeline_mode<synchronous>, transform_indices = @transform_6, window_bounds = array<i64: 1, 128>}, {transform_indices = @transform_7, window_bounds = array<i64: 8, 128>}]} {
    %c0 = arith.constant 0 : index
    %c0_0 = arith.constant 0 : index
    %0 = vector.load %arg1[%c0, %c0_0] : memref<8x128xf32, #tpu.memory_space<vmem>>, vector<8x128xf32>
    %c0_1 = arith.constant 0 : index
    %c0_2 = arith.constant 0 : index
    %1 = vector.load %arg2[%c0_1, %c0_2] : memref<128x128xf32, #tpu.memory_space<vmem>>, vector<128x128xf32>
    %cst = arith.constant dense<0.000000e+00> : vector<8x128xf32>
    %2 = tpu.matmul %0, %1, %cst {dimension_numbers = #tpu.dot_dimension_numbers<[1], [0], [0], [1], [0, 0, 1, 1], [], []>} : vector<8x128xf32>, vector<128x128xf32>, vector<8x128xf32> -> vector<8x128xf32>
    %c0_3 = arith.constant 0 : index
    %c0_4 = arith.constant 0 : index
    %3 = vector.load %arg3[%c0_3, %c0_4] : memref<1x128xf32, #tpu.memory_space<vmem>>, vector<1x128xf32>
    %4 = vector.broadcast %3 : vector<1x128xf32> to vector<8x128xf32>
    %5 = arith.addf %2, %4 : vector<8x128xf32>
    %cst_5 = arith.constant 0.000000e+00 : f32
    %6 = vector.broadcast %cst_5 : f32 to vector<8x128xf32>
    %7 = arith.maximumf %5, %6 : vector<8x128xf32>
    %c0_6 = arith.constant 0 : index
    %c0_7 = arith.constant 0 : index
    %8 = vector.load %arg4[%c0_6, %c0_7] : memref<128x128xf32, #tpu.memory_space<vmem>>, vector<128x128xf32>
    %cst_8 = arith.constant dense<0.000000e+00> : vector<8x128xf32>
    %9 = tpu.matmul %7, %8, %cst_8 {dimension_numbers = #tpu.dot_dimension_numbers<[1], [0], [0], [1], [0, 0, 1, 1], [], []>} : vector<8x128xf32>, vector<128x128xf32>, vector<8x128xf32> -> vector<8x128xf32>
    %c0_9 = arith.constant 0 : index
    %c0_10 = arith.constant 0 : index
    %10 = vector.load %arg5[%c0_9, %c0_10] : memref<1x128xf32, #tpu.memory_space<vmem>>, vector<1x128xf32>
    %11 = vector.broadcast %10 : vector<1x128xf32> to vector<8x128xf32>
    %12 = arith.addf %9, %11 : vector<8x128xf32>
    %cst_11 = arith.constant 0.000000e+00 : f32
    %13 = vector.broadcast %cst_11 : f32 to vector<8x128xf32>
    %14 = arith.maximumf %12, %13 : vector<8x128xf32>
    %c0_12 = arith.constant 0 : index
    %c0_13 = arith.constant 0 : index
    %15 = vector.load %arg6[%c0_12, %c0_13] : memref<128x128xf32, #tpu.memory_space<vmem>>, vector<128x128xf32>
    %cst_14 = arith.constant dense<0.000000e+00> : vector<8x128xf32>
    %16 = tpu.matmul %14, %15, %cst_14 {dimension_numbers = #tpu.dot_dimension_numbers<[1], [0], [0], [1], [0, 0, 1, 1], [], []>} : vector<8x128xf32>, vector<128x128xf32>, vector<8x128xf32> -> vector<8x128xf32>
    %c0_15 = arith.constant 0 : index
    %c0_16 = arith.constant 0 : index
    %17 = vector.load %arg7[%c0_15, %c0_16] : memref<1x128xf32, #tpu.memory_space<vmem>>, vector<1x128xf32>
    %18 = vector.broadcast %17 : vector<1x128xf32> to vector<8x128xf32>
    %19 = arith.addf %16, %18 : vector<8x128xf32>
    %cst_17 = arith.constant 0.000000e+00 : f32
    %20 = vector.broadcast %cst_17 : f32 to vector<8x128xf32>
    %21 = arith.maximumf %19, %20 : vector<8x128xf32>
    %c0_18 = arith.constant 0 : index
    %c0_19 = arith.constant 0 : index
    %22 = vector.load %arg8[%c0_18, %c0_19] : memref<8x128xf32, #tpu.memory_space<vmem>>, vector<8x128xf32>
    tpu.vector_store %arg8[%c0_18, %c0_19], %21 {strides = array<i32>} : memref<8x128xf32, #tpu.memory_space<vmem>>, vector<8x128xf32>,
    return
  }
  func.func @transform_0(%arg0: i32) -> (i32, i32) {
    %c0_i32 = arith.constant 0 : i32
    %c0_i32_0 = arith.constant 0 : i32
    return %arg0, %c0_i32 : i32, i32
  }
  func.func @transform_1(%arg0: i32) -> (i32, i32) {
    %c0_i32 = arith.constant 0 : i32
    %c0_i32_0 = arith.constant 0 : i32
    %c0_i32_1 = arith.constant 0 : i32
    return %c0_i32, %c0_i32_0 : i32, i32
  }
  func.func @transform_2(%arg0: i32) -> (i32, i32) {
    %c0_i32 = arith.constant 0 : i32
    %c0_i32_0 = arith.constant 0 : i32
    %c0_i32_1 = arith.constant 0 : i32
    return %c0_i32, %c0_i32_0 : i32, i32
  }
  func.func @transform_3(%arg0: i32) -> (i32, i32) {
    %c0_i32 = arith.constant 0 : i32
    %c0_i32_0 = arith.constant 0 : i32
    %c0_i32_1 = arith.constant 0 : i32
    return %c0_i32, %c0_i32_0 : i32, i32
  }
  func.func @transform_4(%arg0: i32) -> (i32, i32) {
    %c0_i32 = arith.constant 0 : i32
    %c0_i32_0 = arith.constant 0 : i32
    %c0_i32_1 = arith.constant 0 : i32
    return %c0_i32, %c0_i32_0 : i32, i32
  }
  func.func @transform_5(%arg0: i32) -> (i32, i32) {
    %c0_i32 = arith.constant 0 : i32
    %c0_i32_0 = arith.constant 0 : i32
    %c0_i32_1 = arith.constant 0 : i32
    return %c0_i32, %c0_i32_0 : i32, i32
  }
  func.func @transform_6(%arg0: i32) -> (i32, i32) {
    %c0_i32 = arith.constant 0 : i32
    %c0_i32_0 = arith.constant 0 : i32
    %c0_i32_1 = arith.constant 0 : i32
    return %c0_i32, %c0_i32_0 : i32, i32
  }
  func.func @transform_7(%arg0: i32) -> (i32, i32) {
    %c0_i32 = arith.constant 0 : i32
    %c0_i32_0 = arith.constant 0 : i32
    return %arg0, %c0_i32 : i32, i32
  }
}

module attributes {stable_mosaic.version = 11 : i64} {
  func.func @linker_kernel(%arg0: i32, %arg1: memref<8x128xf32, #tpu.memory_space<vmem>>, %arg2: memref<128x128xf32, #tpu.memory_space<vmem>>, %arg3: memref<1x128xf32, #tpu.memory_space<vmem>>, %arg4: memref<128x128xf32, #tpu.memory_space<vmem>>, %arg5: memref<1x128xf32, #tpu.memory_space<vmem>>, %arg6: memref<128x128xf32, #tpu.memory_space<vmem>>, %arg7: memref<1x128xf32, #tpu.memory_space<vmem>>, %arg8: memref<8x128xf32, #tpu.memory_space<vmem>>) attributes {dimension_semantics = [#tpu.dimension_semantics<parallel>], iteration_bounds = array<i64: 1>, scalar_prefetch = 0 : i64, scratch_operands = 0 : i64, tpu.core_type = #tpu.core_type<tc>, window_params = [{transform_indices = @transform_0, window_bounds = array<i64: 8, 128>}, {pipeline_mode = #tpu.pipeline_mode<synchronous>, transform_indices = @transform_1, window_bounds = array<i64: 128, 128>}, {pipeline_mode = #tpu.pipeline_mode<synchronous>, transform_indices = @transform_2, window_bounds = array<i64: 1, 128>}, {pipeline_mode = #tpu.pipeline_mode<synchronous>, transform_indices = @transform_3, window_bounds = array<i64: 128, 128>}, {pipeline_mode = #tpu.pipeline_mode<synchronous>, transform_indices = @transform_4, window_bounds = array<i64: 1, 128>}, {pipeline_mode = #tpu.pipeline_mode<synchronous>, transform_indices = @transform_5, window_bounds = array<i64: 128, 128>}, {pipeline_mode = #tpu.pipeline_mode<synchronous>, transform_indices = @transform_6, window_bounds = array<i64: 1, 128>}, {transform_indices = @transform_7, window_bounds = array<i64: 8, 128>}]} {
    %c0 = arith.constant 0 : index
    %c0_0 = arith.constant 0 : index
    %0 = vector.load %arg1[%c0, %c0_0] : memref<8x128xf32, #tpu.memory_space<vmem>>, vector<8x128xf32>
    %c0_1 = arith.constant 0 : index
    %c0_2 = arith.constant 0 : index
    %1 = vector.load %arg2[%c0_1, %c0_2] : memref<128x128xf32, #tpu.memory_space<vmem>>, vector<128x128xf32>
    %cst = arith.constant dense<0.000000e+00> : vector<8x128xf32>
    %2 = tpu.matmul %0, %1, %cst {dimension_numbers = #tpu.dot_dimension_numbers<[1], [0], [0], [1], [0, 0, 1, 1], [], []>} : vector<8x128xf32>, vector<128x128xf32>, vector<8x128xf32> -> vector<8x128xf32>
    %c0_3 = arith.constant 0 : index
    %c0_4 = arith.constant 0 : index
    %3 = vector.load %arg3[%c0_3, %c0_4] : memref<1x128xf32, #tpu.memory_space<vmem>>, vector<1x128xf32>
    %4 = vector.broadcast %3 : vector<1x128xf32> to vector<8x128xf32>
    %5 = arith.addf %2, %4 : vector<8x128xf32>
    %cst_5 = arith.constant 0.000000e+00 : f32
    %6 = vector.broadcast %cst_5 : f32 to vector<8x128xf32>
    %7 = arith.maximumf %5, %6 : vector<8x128xf32>
    %c0_6 = arith.constant 0 : index
    %c0_7 = arith.constant 0 : index
    %8 = vector.load %arg4[%c0_6, %c0_7] : memref<128x128xf32, #tpu.memory_space<vmem>>, vector<128x128xf32>
    %cst_8 = arith.constant dense<0.000000e+00> : vector<8x128xf32>
    %9 = tpu.matmul %7, %8, %cst_8 {dimension_numbers = #tpu.dot_dimension_numbers<[1], [0], [0], [1], [0, 0, 1, 1], [], []>} : vector<8x128xf32>, vector<128x128xf32>, vector<8x128xf32> -> vector<8x128xf32>
    %c0_9 = arith.constant 0 : index
    %c0_10 = arith.constant 0 : index
    %10 = vector.load %arg5[%c0_9, %c0_10] : memref<1x128xf32, #tpu.memory_space<vmem>>, vector<1x128xf32>
    %11 = vector.broadcast %10 : vector<1x128xf32> to vector<8x128xf32>
    %12 = arith.addf %9, %11 : vector<8x128xf32>
    %cst_11 = arith.constant 0.000000e+00 : f32
    %13 = vector.broadcast %cst_11 : f32 to vector<8x128xf32>
    %14 = arith.maximumf %12, %13 : vector<8x128xf32>
    %c0_12 = arith.constant 0 : index
    %c0_13 = arith.constant 0 : index
    %15 = vector.load %arg6[%c0_12, %c0_13] : memref<128x128xf32, #tpu.memory_space<vmem>>, vector<128x128xf32>
    %cst_14 = arith.constant dense<0.000000e+00> : vector<8x128xf32>
    %16 = tpu.matmul %14, %15, %cst_14 {dimension_numbers = #tpu.dot_dimension_numbers<[1], [0], [0], [1], [0, 0, 1, 1], [], []>} : vector<8x128xf32>, vector<128x128xf32>, vector<8x128xf32> -> vector<8x128xf32>
    %c0_15 = arith.constant 0 : index
    %c0_16 = arith.constant 0 : index
    %17 = vector.load %arg7[%c0_15, %c0_16] : memref<1x128xf32, #tpu.memory_space<vmem>>, vector<1x128xf32>
    %18 = vector.broadcast %17 : vector<1x128xf32> to vector<8x128xf32>
    %19 = arith.addf %16, %18 : vector<8x128xf32>
    %cst_17 = arith.constant 0.000000e+00 : f32
    %20 = vector.broadcast %cst_17 : f32 to vector<8x128xf32>
    %21 = arith.maximumf %19, %20 : vector<8x128xf32>
    %c0_18 = arith.constant 0 : index
    %c0_19 = arith.constant 0 : index
    %22 = vector.load %arg8[%c0_18, %c0_19] : memref<8x128xf32, #tpu.memory_space<vmem>>, vector<8x128xf32>
    tpu.vector_store %arg8[%c0_18, %c0_19], %21 {strides = array<i32>} : memref<8x128xf32, #tpu.memory_space<vmem>>, vector<8x128xf32>,
    return
  }
  func.func @transform_0(%arg0: i32) -> (i32, i32) {
    %c0_i32 = arith.constant 0 : i32
    %c0_i32_0 = arith.constant 0 : i32
    return %arg0, %c0_i32 : i32, i32
  }
  func.func @transform_1(%arg0: i32) -> (i32, i32) {
    %c0_i32 = arith.constant 0 : i32
    %c0_i32_0 = arith.constant 0 : i32
    %c0_i32_1 = arith.constant 0 : i32
    return %c0_i32, %c0_i32_0 : i32, i32
  }
  func.func @transform_2(%arg0: i32) -> (i32, i32) {
    %c0_i32 = arith.constant 0 : i32
    %c0_i32_0 = arith.constant 0 : i32
    %c0_i32_1 = arith.constant 0 : i32
    return %c0_i32, %c0_i32_0 : i32, i32
  }
  func.func @transform_3(%arg0: i32) -> (i32, i32) {
    %c0_i32 = arith.constant 0 : i32
    %c0_i32_0 = arith.constant 0 : i32
    %c0_i32_1 = arith.constant 0 : i32
    return %c0_i32, %c0_i32_0 : i32, i32
  }
  func.func @transform_4(%arg0: i32) -> (i32, i32) {
    %c0_i32 = arith.constant 0 : i32
    %c0_i32_0 = arith.constant 0 : i32
    %c0_i32_1 = arith.constant 0 : i32
    return %c0_i32, %c0_i32_0 : i32, i32
  }
  func.func @transform_5(%arg0: i32) -> (i32, i32) {
    %c0_i32 = arith.constant 0 : i32
    %c0_i32_0 = arith.constant 0 : i32
    %c0_i32_1 = arith.constant 0 : i32
    return %c0_i32, %c0_i32_0 : i32, i32
  }
  func.func @transform_6(%arg0: i32) -> (i32, i32) {
    %c0_i32 = arith.constant 0 : i32
    %c0_i32_0 = arith.constant 0 : i32
    %c0_i32_1 = arith.constant 0 : i32
    return %c0_i32, %c0_i32_0 : i32, i32
  }
  func.func @transform_7(%arg0: i32) -> (i32, i32) {
    %c0_i32 = arith.constant 0 : i32
    %c0_i32_0 = arith.constant 0 : i32
    return %arg0, %c0_i32 : i32, i32
  }
}

</mosaic_0001>

<bundles_post_ra>
// kernel: tpu_custom_call.1
= control target key start
LH: loop header
LB: loop body
LE: loop exit
PB: predicated region body
PF: predicated region fallthrough
CT: control target
= control target key end

     0   :  { %12 = vsyncpa [#allocation3], 0  ;;  %s898_s0 = inlined_call_operand.hbm [shape: f32[8,128], index: 0, kind: input, shape index: {}]   ;;  %s899_s1 = inlined_call_operand.hbm [shape: f32[128,128], index: 1, kind: input, shape index: {}]   ;;  %s900_s2 = inlined_call_operand.vmem [shape: f32[1,128], index: 2, kind: input, shape index: {}]   ;;  %s901_s3 = inlined_call_operand.hbm [shape: f32[128,128], index: 3, kind: input, shape index: {}]   ;;  %s902_s4 = inlined_call_operand.vmem [shape: f32[1,128], index: 4, kind: input, shape index: {}]   ;;  %s903_s5 = inlined_call_operand.hbm [shape: f32[128,128], index: 5, kind: input, shape index: {}]   ;;  %s904_s6 = inlined_call_operand.vmem [shape: f32[1,128], index: 6, kind: input, shape index: {}]   ;;  %s905_s7 = inlined_call_operand.hbm [shape: f32[8,128], index: 7, kind: output, shape index: {}]  }
   0x1   :  { %13 = vsyncpa [#allocation6], 0 }
   0x2   :  { %14 = vsyncpa [#allocation9], 0 }
   0x3   :  { %15 = vsyncpa [#allocation4], 0  ;;  %s740_s24 = smov [#allocation5]   ;;  %s622_s28 = scalar_lea.hbm %s899_s1, 2048 }
   0x4   :  { %s31_s25 = sshll.u32 %s740_s24, 4  ;;  %p623_p0 = scmp.ne.s32.totalorder %s899_s1, %s622_s28  ;;  %s32_s25 = int_to_ptr.vmem [resolvable:$true] %s31_s25 }
   0x5   :  { %p626_p1 = scmp.lt.u32.totalorder %s622_s28, %s899_s1 }
   0x7   :  { %p628_p2 = pnand %p626_p1, %p623_p0 }
   0x9   :  { %631 = shalt.err (!%p628_p2)
}
   0xa   :  { %s632_s10 = scalar_lea.vmem %s32_s25, 2048  ;;  %p637_p4 = scmp.lt.s32.totalorder %s32_s25, %s32_s25 }
   0xb   :  { %p633_p3 = scmp.ne.s32.totalorder %s32_s25, %s632_s10  ;;  %p638_p5 = scmp.lt.s32.totalorder %s632_s10, %s632_s10 }
   0xd   :  { %p639_p6 = por %p638_p5, %p637_p4 }
   0xf   :  { %p640_p7 = pnand %p639_p6, %p633_p3 }
  0x11   :  { %643 = shalt.err (!%p640_p7)
}
  0x12   :  { %s741_s11 = smov 128   ;;  %s742_s12 = smov 8  }
  0x13   :  { %37 = dma.hbm_to_vmem [thread:$0]  %s899_s1, 2048, %s32_s25, [#allocation6], %s741_s11, %s741_s11, %s742_s12  }
  0x14   :  { %s743_s15 = smov [#allocation2]   ;;  %s744_s17 = smov [#allocation7]  }
  0x15   :  { %s22_s16 = sshll.u32 %s743_s15, 4  ;;  %s45_s18 = sshll.u32 %s744_s17, 4  ;;  %s23_s16 = int_to_ptr.vmem [resolvable:$true] %s22_s16  ;;  %s46_s18 = int_to_ptr.vmem [resolvable:$true] %s45_s18 }
  0x16   :  { %s644_s21 = scalar_lea.hbm %s898_s0, 128 }
  0x17   :  { %p645_p8 = scmp.ne.s32.totalorder %s898_s0, %s644_s21  ;;  %p648_p9 = scmp.lt.u32.totalorder %s644_s21, %s898_s0 }
  0x19   :  { %p650_p10 = pnand %p648_p9, %p645_p8 }
  0x1b   :  { %653 = shalt.err (!%p650_p10)
}
  0x1c   :  { %s654_s1 = scalar_lea.vmem %s23_s16, 128  ;;  %p659_p12 = scmp.lt.s32.totalorder %s23_s16, %s23_s16 }
  0x1d   :  { %p655_p11 = scmp.ne.s32.totalorder %s23_s16, %s654_s1  ;;  %p660_p13 = scmp.lt.s32.totalorder %s654_s1, %s654_s1 }
  0x1f   :  { %p661_p0 = por %p660_p13, %p659_p12 }
  0x21   :  { %p662_p1 = pnand %p661_p0, %p655_p11 }
  0x23   :  { %665 = shalt.err (!%p662_p1)
}
  0x24   :  { %25 = dma.hbm_to_vmem [thread:$0]  %s898_s0, 128, %s23_s16, [#allocation3]  }
  0x25   :  { %s666_s30 = scalar_lea.hbm %s901_s3, 2048 }
  0x26   :  { %p667_p2 = scmp.ne.s32.totalorder %s901_s3, %s666_s30  ;;  %p670_p3 = scmp.lt.u32.totalorder %s666_s30, %s901_s3 }
  0x28   :  { %p672_p4 = pnand %p670_p3, %p667_p2 }
  0x2a   :  { %675 = shalt.err (!%p672_p4)
}
  0x2b   :  { %s676_s14 = scalar_lea.vmem %s46_s18, 2048  ;;  %p681_p6 = scmp.lt.s32.totalorder %s46_s18, %s46_s18 }
  0x2c   :  { %p677_p5 = scmp.ne.s32.totalorder %s46_s18, %s676_s14  ;;  %p682_p7 = scmp.lt.s32.totalorder %s676_s14, %s676_s14 }
  0x2e   :  { %p683_p8 = por %p682_p7, %p681_p6 }
  0x30   :  { %p684_p9 = pnand %p683_p8, %p677_p5 }
  0x32   :  { %687 = shalt.err (!%p684_p9)
}
  0x33   :  { %51 = dma.hbm_to_vmem [thread:$0]  %s901_s3, 2048, %s46_s18, [#allocation6], %s741_s11, %s741_s11, %s742_s12  }
  0x34   :  { %s745_s16 = smov [#allocation8]   ;;  %s688_s21 = scalar_lea.hbm %s903_s5, 2048 }
  0x35   :  { %s59_s17 = sshll.u32 %s745_s16, 4  ;;  %p689_p10 = scmp.ne.s32.totalorder %s903_s5, %s688_s21  ;;  %s60_s17 = int_to_ptr.vmem [resolvable:$true] %s59_s17 }
  0x36   :  { %p692_p11 = scmp.lt.u32.totalorder %s688_s21, %s903_s5 }
  0x38   :  { %p694_p12 = pnand %p692_p11, %p689_p10 }
  0x3a   :  { %697 = shalt.err (!%p694_p12)
}
  0x3b   :  { %s698_s1 = scalar_lea.vmem %s60_s17, 2048  ;;  %p703_p0 = scmp.lt.s32.totalorder %s60_s17, %s60_s17 }
  0x3c   :  { %p699_p13 = scmp.ne.s32.totalorder %s60_s17, %s698_s1  ;;  %p704_p1 = scmp.lt.s32.totalorder %s698_s1, %s698_s1 }
  0x3e   :  { %p705_p2 = por %p704_p1, %p703_p0 }
  0x40   :  { %p706_p3 = pnand %p705_p2, %p699_p13 }
  0x42   :  { %709 = shalt.err (!%p706_p3)
}
  0x43   :  { %65 = dma.hbm_to_vmem [thread:$0]  %s903_s5, 2048, %s60_s17, [#allocation9], %s741_s11, %s741_s11, %s742_s12  }
  0x44   :  { %732 = dma.done.wait [#allocation3], 128  }
  0x45   :  { %733 = vsyncadd [#allocation3], 4294967168 }
  0x46   :  { %734 = dma.done.wait [#allocation6], 4096  }
  0x47   :  { %735 = vsyncadd [#allocation6], 4294963200 }
  0x48   :  { %736 = dma.done.wait [#allocation9], 2048  }
  0x49   :  { %737 = vsyncadd [#allocation9], 4294965248  ;;  %v746_v0 = vmov 0.0|0.0   ;;  %vm747_vm0 = vmmov 0   ;;  %v748_v1 = vmov 0.0   ;;  %v81_v2 = vld [vmem:[#allocation5] sm:$0xff] }
  0x4a   :  { %540 = vmatprep.subr.bf16.mxu0 %v746_v0  ;;  %467 = vmatprep.mubr.msk.f32.mxu0 %vm747_vm0, %v748_v1  ;;  %v82_v3 = vld [vmem:[#allocation5 + $0x8] sm:$0xff]  ;;  %v83_v4 = vld [vmem:[#allocation5 + $0x10] sm:$0xff]  ;;  %v84_v6 = vld [vmem:[#allocation5 + $0x18] sm:$0xff]  ;;  %s749_s28 = smov [#allocation10]  }
  0x4b   :  { %564 = vmatprep.subr.bf16.mxu1 %v746_v0  ;;  %502 = vmatprep.mubr.msk.f32.mxu1 %vm747_vm0, %v748_v1  ;;  %v541_v5 = vpack.c.bf16 %v82_v3, %v81_v2  ;;  %v544_v7 = vpack.c.bf16 %v84_v6, %v83_v4  ;;  %v85_v8 = vld [vmem:[#allocation5 + $0x20] sm:$0xff]  ;;  %v86_v9 = vld [vmem:[#allocation5 + $0x28] sm:$0xff]  ;;  %v177_v12 = vld [vmem:[#allocation7 + $0x10] sm:$0xff]  ;;  %s370_s29 = sshll.u32 %s749_s28, 4  ;;  %s371_s29 = int_to_ptr.vmem [resolvable:$true] %s370_s29 }
  0x4c   :  { %v175_v10 = vld [vmem:[#allocation7] sm:$0xff]  ;;  %v176_v11 = vld [vmem:[#allocation7 + $0x8] sm:$0xff]  ;;  %v178_v13 = vld [vmem:[#allocation7 + $0x18] sm:$0xff]  ;;  %v547_v14 = vpack.c.bf16 %v86_v9, %v85_v8  ;;  %s710_s30 = scalar_lea.vmem %s371_s29, 128  ;;  %p715_p5 = scmp.lt.s32.totalorder %s371_s29, %s371_s29 }
  0x4d   :  { %542 = vmatpush3.bf16.msra.mxu0 %v541_v5  ;;  %v565_v15 = vpack.c.bf16 %v176_v11, %v175_v10  ;;  %v87_v16 = vld [vmem:[#allocation5 + $0x30] sm:$0xff]  ;;  %v88_v17 = vld [vmem:[#allocation5 + $0x38] sm:$0xff]  ;;  %v568_v18 = vpack.c.bf16 %v178_v13, %v177_v12  ;;  %v179_v19 = vld [vmem:[#allocation7 + $0x20] sm:$0xff]  ;;  %p711_p4 = scmp.ne.s32.totalorder %s371_s29, %s710_s30  ;;  %p716_p6 = scmp.lt.s32.totalorder %s710_s30, %s710_s30 }
  0x4e   :  { %543 = vmatprep.subr.bf16.mxu0 %v746_v0  ;;  %v180_v20 = vld [vmem:[#allocation7 + $0x28] sm:$0xff]  ;;  %v550_v21 = vpack.c.bf16 %v88_v17, %v87_v16  ;;  %v89_v22 = vld [vmem:[#allocation5 + $0x40] sm:$0xff]  ;;  %v181_v25 = vld [vmem:[#allocation7 + $0x30] sm:$0xff] }
  0x4f   :  { %566 = vmatpush3.bf16.msra.mxu1 %v565_v15  ;;  %v90_v23 = vld [vmem:[#allocation5 + $0x48] sm:$0xff]  ;;  %v571_v24 = vpack.c.bf16 %v180_v20, %v179_v19  ;;  %v182_v26 = vld [vmem:[#allocation7 + $0x38] sm:$0xff]  ;;  %v91_v28 = vld [vmem:[#allocation5 + $0x50] sm:$0xff]  ;;  %p717_p7 = por %p716_p6, %p715_p5 }
  0x50   :  { %567 = vmatprep.subr.bf16.mxu1 %v746_v0  ;;  %v553_v27 = vpack.c.bf16 %v90_v23, %v89_v22  ;;  %v92_v29 = vld [vmem:[#allocation5 + $0x58] sm:$0xff]  ;;  %v574_v30 = vpack.c.bf16 %v182_v26, %v181_v25  ;;  %v183_v31 = vld [vmem:[#allocation7 + $0x40] sm:$0xff]  ;;  %v184_v32 = vld [vmem:[#allocation7 + $0x48] sm:$0xff] }
  0x51   :  { %545 = vmatpush3.bf16.msra.mxu0 %v544_v7  ;;  %v556_v33 = vpack.c.bf16 %v92_v29, %v91_v28  ;;  %v93_v34 = vld [vmem:[#allocation5 + $0x60] sm:$0xff]  ;;  %v94_v35 = vld [vmem:[#allocation5 + $0x68] sm:$0xff]  ;;  %v577_v36 = vpack.c.bf16 %v184_v32, %v183_v31  ;;  %v185_v37 = vld [vmem:[#allocation7 + $0x50] sm:$0xff]  ;;  %p718_p8 = pnand %p717_p7, %p711_p4 }
  0x52   :  { %546 = vmatprep.subr.bf16.mxu0 %v746_v0  ;;  %v186_v38 = vld [vmem:[#allocation7 + $0x58] sm:$0xff]  ;;  %v559_v39 = vpack.c.bf16 %v94_v35, %v93_v34  ;;  %v95_v40 = vld [vmem:[#allocation5 + $0x70] sm:$0xff]  ;;  %v187_v43 = vld [vmem:[#allocation7 + $0x60] sm:$0xff] }
  0x53   :  { %569 = vmatpush3.bf16.msra.mxu1 %v568_v18  ;;  %v96_v41 = vld [vmem:[#allocation5 + $0x78] sm:$0xff]  ;;  %v580_v42 = vpack.c.bf16 %v186_v38, %v185_v37  ;;  %v188_v44 = vld [vmem:[#allocation7 + $0x68] sm:$0xff]  ;;  %v189_v48 = vld [vmem:[#allocation7 + $0x70] sm:$0xff] }
  0x54   :  { %570 = vmatprep.subr.bf16.mxu1 %v746_v0  ;;  %v562_v45 = vpack.c.bf16 %v96_v41, %v95_v40  ;;  %v583_v46 = vpack.c.bf16 %v188_v44, %v187_v43  ;;  %v80_v47 = vld [vmem:[#allocation2] sm:$0xff]  ;;  %v269_v51 = vld [vmem:[#allocation8] sm:$0xff]  ;;  %v270_v52 = vld [vmem:[#allocation8 + $0x8] sm:$0xff] }
  0x55   :  { %548 = vmatpush3.bf16.msra.mxu0 %v547_v14  ;;  %v190_v49 = vld [vmem:[#allocation7 + $0x78] sm:$0xff]  ;;  %v271_v53 = vld [vmem:[#allocation8 + $0x10] sm:$0xff]  ;;  %v589_v54 = vpack.c.bf16 %v270_v52, %v269_v51  ;;  %v273_v57 = vld [vmem:[#allocation8 + $0x20] sm:$0xff] }
  0x56   :  { %549 = vmatprep.subr.bf16.mxu0 %v746_v0  ;;  %v586_v50 = vpack.c.bf16 %v190_v49, %v189_v48  ;;  %v272_v55 = vld [vmem:[#allocation8 + $0x18] sm:$0xff]  ;;  %v274_v58 = vld [vmem:[#allocation8 + $0x28] sm:$0xff]  ;;  %v275_v60 = vld [vmem:[#allocation8 + $0x30] sm:$0xff] }
  0x57   :  { %572 = vmatpush3.bf16.msra.mxu1 %v571_v24  ;;  %v592_v56 = vpack.c.bf16 %v272_v55, %v271_v53  ;;  %v595_v59 = vpack.c.bf16 %v274_v58, %v273_v57  ;;  %v276_v61 = vld [vmem:[#allocation8 + $0x38] sm:$0xff]  ;;  %v277_v63 = vld [vmem:[#allocation8 + $0x40] sm:$0xff]  ;;  %v279_v3 = vld [vmem:[#allocation8 + $0x50] sm:$0xff] }
  0x58   :  { %573 = vmatprep.subr.bf16.mxu1 %v746_v0  ;;  %v598_v62 = vpack.c.bf16 %v276_v61, %v275_v60  ;;  %v280_v4 = vld [vmem:[#allocation8 + $0x58] sm:$0xff]  ;;  %v281_v6 = vld [vmem:[#allocation8 + $0x60] sm:$0xff]  ;;  %v282_v7 = vld [vmem:[#allocation8 + $0x68] sm:$0xff] }
  0x59   :  { %551 = vmatpush3.bf16.msra.mxu0 %v550_v21  ;;  %v604_v5 = vpack.c.bf16 %v280_v4, %v279_v3  ;;  %v607_v8 = vpack.c.bf16 %v282_v7, %v281_v6  ;;  %v381_v9 = vld [vmem:[%s900_s2] ss:$0 sm:$0xff]  ;;  %v283_v14 = vld [vmem:[#allocation8 + $0x70] sm:$0xff] }
  0x5a   :  { %552 = vmatprep.subr.bf16.mxu0 %v746_v0  ;;  %v284_v15 = vld [vmem:[#allocation8 + $0x78] sm:$0xff] }
  0x5b   :  { %575 = vmatpush3.bf16.msra.mxu1 %v574_v30  ;;  %v610_v16 = vpack.c.bf16 %v284_v15, %v283_v14  ;;  %v382_v17 = vld [vmem:[%s902_s4] ss:$0 sm:$0xff] }
  0x5c   :  { %576 = vmatprep.subr.bf16.mxu1 %v746_v0  ;;  %v383_v21 = vld [vmem:[%s904_s6] ss:$0 sm:$0xff] }
  0x5d   :  { %554 = vmatpush3.bf16.msra.mxu0 %v553_v27 }
  0x5e   :  { %555 = vmatprep.subr.bf16.mxu0 %v746_v0 }
  0x5f   :  { %578 = vmatpush3.bf16.msra.mxu1 %v577_v36 }
  0x60   :  { %579 = vmatprep.subr.bf16.mxu1 %v746_v0 }
  0x61   :  { %557 = vmatpush3.bf16.msra.mxu0 %v556_v33 }
  0x62   :  { %558 = vmatprep.subr.bf16.mxu0 %v746_v0 }
  0x63   :  { %581 = vmatpush3.bf16.msra.mxu1 %v580_v42 }
  0x64   :  { %582 = vmatprep.subr.bf16.mxu1 %v746_v0 }
  0x65   :  { %560 = vmatpush3.bf16.msra.mxu0 %v559_v39 }
  0x66   :  { %561 = vmatprep.subr.bf16.mxu0 %v746_v0 }
  0x67   :  { %584 = vmatpush3.bf16.msra.mxu1 %v583_v46 }
  0x68   :  { %585 = vmatprep.subr.bf16.mxu1 %v746_v0 }
  0x69   :  { %563 = vmatpush3.bf16.msra.mxu0 %v562_v45 }
  0x6a   :  { %588 = vmatprep.subr.bf16.mxu0 %v746_v0 }
  0x6b   :  { %587 = vmatpush3.bf16.msra.mxu1 %v586_v50 }
  0x6c   :  { %468 = vmatmul.mubr.f32.vlgmr.msra.gmra.mrb[0].mxu0 %v80_v47 }
  0x6d   :  { %537 = vmatprep.mubr.msk.f32.mxu0 %vm747_vm0, %v748_v1  ;;  %590 = vmatpush3.bf16.msra.mxu0 %v589_v54  ;;  %v278_v1 = vld [vmem:[#allocation8 + $0x48] sm:$0xff] }
  0x6e   :  { %591 = vmatprep.subr.bf16.mxu0 %v746_v0  ;;  %v601_v2 = vpack.c.bf16 %v278_v1, %v277_v63 }
  0x71   :  { %593 = vmatpush3.bf16.msra.mxu0 %v592_v56 }
  0x72   :  { %594 = vmatprep.subr.bf16.mxu0 %v746_v0 }
  0x75   :  { %596 = vmatpush3.bf16.msra.mxu0 %v595_v59 }
  0x76   :  { %597 = vmatprep.subr.bf16.mxu0 %v746_v0 }
  0x79   :  { %599 = vmatpush3.bf16.msra.mxu0 %v598_v62 }
  0x7a   :  { %600 = vmatprep.subr.bf16.mxu0 %v746_v0 }
  0x7d   :  { %602 = vmatpush3.bf16.msra.mxu0 %v601_v2 }
  0x7e   :  { %603 = vmatprep.subr.bf16.mxu0 %v746_v0 }
  0x81   :  { %605 = vmatpush3.bf16.msra.mxu0 %v604_v5 }
  0x82   :  { %606 = vmatprep.subr.bf16.mxu0 %v746_v0 }
  0x85   :  { %608 = vmatpush3.bf16.msra.mxu0 %v607_v8 }
  0x86   :  { %609 = vmatprep.subr.bf16.mxu0 %v746_v0 }
  0x89   :  { %611 = vmatpush3.bf16.msra.mxu0 %v610_v16 }
 0x13f   :  { %v170_v10 = vpop.f32.mrb[0].mxu0 }
 0x140   :  { %v171_v11 = vadd.f32 %v381_v9, %v170_v10  ;;  %v469_v12 = vpop.f32.mrb[1].mxu0 }
 0x142   :  { %v174_v13 = vmax.f32 %v171_v11, 0.0 }
 0x144   :  { %503 = vmatmul.mubr.f32.vlgmr.msra.gmra.mrb[0].mxu1 %v174_v13 }
 0x217   :  { %v264_v18 = vpop.f32.mrb[0].mxu1 }
 0x218   :  { %v265_v19 = vadd.f32 %v382_v17, %v264_v18  ;;  %v504_v0 = vpop.f32.mrb[1].mxu1 }
 0x21a   :  { %v268_v20 = vmax.f32 %v265_v19, 0.0 }
 0x21c   :  { %538 = vmatmul.mubr.f32.vlgmr.msra.gmra.mrb[2].mxu0 %v268_v20 }
 0x2ef   :  { %v358_v22 = vpop.f32.mrb[2].mxu0 }
 0x2f0   :  { %v359_v23 = vadd.f32 %v383_v21, %v358_v22  ;;  %v539_v24 = vpop.f32.mrb[3].mxu0 }
 0x2f2   :  { %v362_v25 = vmax.f32 %v359_v23, 0.0 }
 0x2f4   :  { %363 = vst [vmem:[#allocation10] sm:$0xff] %v362_v25 }
 0x2f5   :  { %721 = shalt.err (!%p718_p8)
}
 0x2f6   :  { %s722_s9 = scalar_lea.hbm %s905_s7, 128 }
 0x2f7   :  { %p723_p9 = scmp.ne.s32.totalorder %s905_s7, %s722_s9  ;;  %p726_p10 = scmp.lt.u32.totalorder %s722_s9, %s905_s7 }
 0x2f9   :  { %p728_p11 = pnand %p726_p10, %p723_p9 }
 0x2fb   :  { %731 = shalt.err (!%p728_p11)
}
 0x2fc   :  { %373 = dma.vmem_to_hbm [thread:$0]  %s371_s29, 128, %s905_s7, [#allocation4]  }
 0x2fd   :  { %738 = dma.done.wait [#allocation4], 128  }
 0x2fe   :  { %739 = vsyncadd [#allocation4], 4294967168 }
 0x2ff   :  { %377 = vsyncpa [#allocation3], 1 }
 0x300   :  { %378 = vsyncpa [#allocation6], 1 }
 0x301   :  { %379 = vsyncpa [#allocation9], 1 }
 0x302   :  { %380 = vsyncpa [#allocation4], 1 }

// kernel: tpu_custom_call.1
= control target key start
LH: loop header
LB: loop body
LE: loop exit
PB: predicated region body
PF: predicated region fallthrough
CT: control target
= control target key end

     0   :  { %12 = vsyncpa [#allocation3], 0  ;;  %s898_s0 = inlined_call_operand.hbm [shape: f32[8,128], index: 0, kind: input, shape index: {}]   ;;  %s899_s1 = inlined_call_operand.hbm [shape: f32[128,128], index: 1, kind: input, shape index: {}]   ;;  %s900_s2 = inlined_call_operand.vmem [shape: f32[1,128], index: 2, kind: input, shape index: {}]   ;;  %s901_s3 = inlined_call_operand.hbm [shape: f32[128,128], index: 3, kind: input, shape index: {}]   ;;  %s902_s4 = inlined_call_operand.vmem [shape: f32[1,128], index: 4, kind: input, shape index: {}]   ;;  %s903_s5 = inlined_call_operand.hbm [shape: f32[128,128], index: 5, kind: input, shape index: {}]   ;;  %s904_s6 = inlined_call_operand.vmem [shape: f32[1,128], index: 6, kind: input, shape index: {}]   ;;  %s905_s7 = inlined_call_operand.hbm [shape: f32[8,128], index: 7, kind: output, shape index: {}]  }
   0x1   :  { %13 = vsyncpa [#allocation6], 0 }
   0x2   :  { %14 = vsyncpa [#allocation9], 0 }
   0x3   :  { %15 = vsyncpa [#allocation4], 0  ;;  %s740_s24 = smov [#allocation5]   ;;  %s622_s28 = scalar_lea.hbm %s899_s1, 2048 }
   0x4   :  { %s31_s25 = sshll.u32 %s740_s24, 4  ;;  %p623_p0 = scmp.ne.s32.totalorder %s899_s1, %s622_s28  ;;  %s32_s25 = int_to_ptr.vmem [resolvable:$true] %s31_s25 }
   0x5   :  { %p626_p1 = scmp.lt.u32.totalorder %s622_s28, %s899_s1 }
   0x7   :  { %p628_p2 = pnand %p626_p1, %p623_p0 }
   0x9   :  { %631 = shalt.err (!%p628_p2)
}
   0xa   :  { %s632_s10 = scalar_lea.vmem %s32_s25, 2048  ;;  %p637_p4 = scmp.lt.s32.totalorder %s32_s25, %s32_s25 }
   0xb   :  { %p633_p3 = scmp.ne.s32.totalorder %s32_s25, %s632_s10  ;;  %p638_p5 = scmp.lt.s32.totalorder %s632_s10, %s632_s10 }
   0xd   :  { %p639_p6 = por %p638_p5, %p637_p4 }
   0xf   :  { %p640_p7 = pnand %p639_p6, %p633_p3 }
  0x11   :  { %643 = shalt.err (!%p640_p7)
}
  0x12   :  { %s741_s11 = smov 128   ;;  %s742_s12 = smov 8  }
  0x13   :  { %37 = dma.hbm_to_vmem [thread:$0]  %s899_s1, 2048, %s32_s25, [#allocation6], %s741_s11, %s741_s11, %s742_s12  }
  0x14   :  { %s743_s15 = smov [#allocation2]   ;;  %s744_s17 = smov [#allocation7]  }
  0x15   :  { %s22_s16 = sshll.u32 %s743_s15, 4  ;;  %s45_s18 = sshll.u32 %s744_s17, 4  ;;  %s23_s16 = int_to_ptr.vmem [resolvable:$true] %s22_s16  ;;  %s46_s18 = int_to_ptr.vmem [resolvable:$true] %s45_s18 }
  0x16   :  { %s644_s21 = scalar_lea.hbm %s898_s0, 128 }
  0x17   :  { %p645_p8 = scmp.ne.s32.totalorder %s898_s0, %s644_s21  ;;  %p648_p9 = scmp.lt.u32.totalorder %s644_s21, %s898_s0 }
  0x19   :  { %p650_p10 = pnand %p648_p9, %p645_p8 }
  0x1b   :  { %653 = shalt.err (!%p650_p10)
}
  0x1c   :  { %s654_s1 = scalar_lea.vmem %s23_s16, 128  ;;  %p659_p12 = scmp.lt.s32.totalorder %s23_s16, %s23_s16 }
  0x1d   :  { %p655_p11 = scmp.ne.s32.totalorder %s23_s16, %s654_s1  ;;  %p660_p13 = scmp.lt.s32.totalorder %s654_s1, %s654_s1 }
  0x1f   :  { %p661_p0 = por %p660_p13, %p659_p12 }
  0x21   :  { %p662_p1 = pnand %p661_p0, %p655_p11 }
  0x23   :  { %665 = shalt.err (!%p662_p1)
}
  0x24   :  { %25 = dma.hbm_to_vmem [thread:$0]  %s898_s0, 128, %s23_s16, [#allocation3]  }
  0x25   :  { %s666_s30 = scalar_lea.hbm %s901_s3, 2048 }
  0x26   :  { %p667_p2 = scmp.ne.s32.totalorder %s901_s3, %s666_s30  ;;  %p670_p3 = scmp.lt.u32.totalorder %s666_s30, %s901_s3 }
  0x28   :  { %p672_p4 = pnand %p670_p3, %p667_p2 }
  0x2a   :  { %675 = shalt.err (!%p672_p4)
}
  0x2b   :  { %s676_s14 = scalar_lea.vmem %s46_s18, 2048  ;;  %p681_p6 = scmp.lt.s32.totalorder %s46_s18, %s46_s18 }
  0x2c   :  { %p677_p5 = scmp.ne.s32.totalorder %s46_s18, %s676_s14  ;;  %p682_p7 = scmp.lt.s32.totalorder %s676_s14, %s676_s14 }
  0x2e   :  { %p683_p8 = por %p682_p7, %p681_p6 }
  0x30   :  { %p684_p9 = pnand %p683_p8, %p677_p5 }
  0x32   :  { %687 = shalt.err (!%p684_p9)
}
  0x33   :  { %51 = dma.hbm_to_vmem [thread:$0]  %s901_s3, 2048, %s46_s18, [#allocation6], %s741_s11, %s741_s11, %s742_s12  }
  0x34   :  { %s745_s16 = smov [#allocation8]   ;;  %s688_s21 = scalar_lea.hbm %s903_s5, 2048 }
  0x35   :  { %s59_s17 = sshll.u32 %s745_s16, 4  ;;  %p689_p10 = scmp.ne.s32.totalorder %s903_s5, %s688_s21  ;;  %s60_s17 = int_to_ptr.vmem [resolvable:$true] %s59_s17 }
  0x36   :  { %p692_p11 = scmp.lt.u32.totalorder %s688_s21, %s903_s5 }
  0x38   :  { %p694_p12 = pnand %p692_p11, %p689_p10 }
  0x3a   :  { %697 = shalt.err (!%p694_p12)
}
  0x3b   :  { %s698_s1 = scalar_lea.vmem %s60_s17, 2048  ;;  %p703_p0 = scmp.lt.s32.totalorder %s60_s17, %s60_s17 }
  0x3c   :  { %p699_p13 = scmp.ne.s32.totalorder %s60_s17, %s698_s1  ;;  %p704_p1 = scmp.lt.s32.totalorder %s698_s1, %s698_s1 }
  0x3e   :  { %p705_p2 = por %p704_p1, %p703_p0 }
  0x40   :  { %p706_p3 = pnand %p705_p2, %p699_p13 }
  0x42   :  { %709 = shalt.err (!%p706_p3)
}
  0x43   :  { %65 = dma.hbm_to_vmem [thread:$0]  %s903_s5, 2048, %s60_s17, [#allocation9], %s741_s11, %s741_s11, %s742_s12  }
  0x44   :  { %732 = dma.done.wait [#allocation3], 128  }
  0x45   :  { %733 = vsyncadd [#allocation3], 4294967168 }
  0x46   :  { %734 = dma.done.wait [#allocation6], 4096  }
  0x47   :  { %735 = vsyncadd [#allocation6], 4294963200 }
  0x48   :  { %736 = dma.done.wait [#allocation9], 2048  }
  0x49   :  { %737 = vsyncadd [#allocation9], 4294965248  ;;  %v746_v0 = vmov 0.0|0.0   ;;  %vm747_vm0 = vmmov 0   ;;  %v748_v1 = vmov 0.0   ;;  %v81_v2 = vld [vmem:[#allocation5] sm:$0xff] }
  0x4a   :  { %540 = vmatprep.subr.bf16.mxu0 %v746_v0  ;;  %467 = vmatprep.mubr.msk.f32.mxu0 %vm747_vm0, %v748_v1  ;;  %v82_v3 = vld [vmem:[#allocation5 + $0x8] sm:$0xff]  ;;  %v83_v4 = vld [vmem:[#allocation5 + $0x10] sm:$0xff]  ;;  %v84_v6 = vld [vmem:[#allocation5 + $0x18] sm:$0xff]  ;;  %s749_s28 = smov [#allocation10]  }
  0x4b   :  { %564 = vmatprep.subr.bf16.mxu1 %v746_v0  ;;  %502 = vmatprep.mubr.msk.f32.mxu1 %vm747_vm0, %v748_v1  ;;  %v541_v5 = vpack.c.bf16 %v82_v3, %v81_v2  ;;  %v544_v7 = vpack.c.bf16 %v84_v6, %v83_v4  ;;  %v85_v8 = vld [vmem:[#allocation5 + $0x20] sm:$0xff]  ;;  %v86_v9 = vld [vmem:[#allocation5 + $0x28] sm:$0xff]  ;;  %v177_v12 = vld [vmem:[#allocation7 + $0x10] sm:$0xff]  ;;  %s370_s29 = sshll.u32 %s749_s28, 4  ;;  %s371_s29 = int_to_ptr.vmem [resolvable:$true] %s370_s29 }
  0x4c   :  { %v175_v10 = vld [vmem:[#allocation7] sm:$0xff]  ;;  %v176_v11 = vld [vmem:[#allocation7 + $0x8] sm:$0xff]  ;;  %v178_v13 = vld [vmem:[#allocation7 + $0x18] sm:$0xff]  ;;  %v547_v14 = vpack.c.bf16 %v86_v9, %v85_v8  ;;  %s710_s30 = scalar_lea.vmem %s371_s29, 128  ;;  %p715_p5 = scmp.lt.s32.totalorder %s371_s29, %s371_s29 }
  0x4d   :  { %542 = vmatpush3.bf16.msra.mxu0 %v541_v5  ;;  %v565_v15 = vpack.c.bf16 %v176_v11, %v175_v10  ;;  %v87_v16 = vld [vmem:[#allocation5 + $0x30] sm:$0xff]  ;;  %v88_v17 = vld [vmem:[#allocation5 + $0x38] sm:$0xff]  ;;  %v568_v18 = vpack.c.bf16 %v178_v13, %v177_v12  ;;  %v179_v19 = vld [vmem:[#allocation7 + $0x20] sm:$0xff]  ;;  %p711_p4 = scmp.ne.s32.totalorder %s371_s29, %s710_s30  ;;  %p716_p6 = scmp.lt.s32.totalorder %s710_s30, %s710_s30 }
  0x4e   :  { %543 = vmatprep.subr.bf16.mxu0 %v746_v0  ;;  %v180_v20 = vld [vmem:[#allocation7 + $0x28] sm:$0xff]  ;;  %v550_v21 = vpack.c.bf16 %v88_v17, %v87_v16  ;;  %v89_v22 = vld [vmem:[#allocation5 + $0x40] sm:$0xff]  ;;  %v181_v25 = vld [vmem:[#allocation7 + $0x30] sm:$0xff] }
  0x4f   :  { %566 = vmatpush3.bf16.msra.mxu1 %v565_v15  ;;  %v90_v23 = vld [vmem:[#allocation5 + $0x48] sm:$0xff]  ;;  %v571_v24 = vpack.c.bf16 %v180_v20, %v179_v19  ;;  %v182_v26 = vld [vmem:[#allocation7 + $0x38] sm:$0xff]  ;;  %v91_v28 = vld [vmem:[#allocation5 + $0x50] sm:$0xff]  ;;  %p717_p7 = por %p716_p6, %p715_p5 }
  0x50   :  { %567 = vmatprep.subr.bf16.mxu1 %v746_v0  ;;  %v553_v27 = vpack.c.bf16 %v90_v23, %v89_v22  ;;  %v92_v29 = vld [vmem:[#allocation5 + $0x58] sm:$0xff]  ;;  %v574_v30 = vpack.c.bf16 %v182_v26, %v181_v25  ;;  %v183_v31 = vld [vmem:[#allocation7 + $0x40] sm:$0xff]  ;;  %v184_v32 = vld [vmem:[#allocation7 + $0x48] sm:$0xff] }
  0x51   :  { %545 = vmatpush3.bf16.msra.mxu0 %v544_v7  ;;  %v556_v33 = vpack.c.bf16 %v92_v29, %v91_v28  ;;  %v93_v34 = vld [vmem:[#allocation5 + $0x60] sm:$0xff]  ;;  %v94_v35 = vld [vmem:[#allocation5 + $0x68] sm:$0xff]  ;;  %v577_v36 = vpack.c.bf16 %v184_v32, %v183_v31  ;;  %v185_v37 = vld [vmem:[#allocation7 + $0x50] sm:$0xff]  ;;  %p718_p8 = pnand %p717_p7, %p711_p4 }
  0x52   :  { %546 = vmatprep.subr.bf16.mxu0 %v746_v0  ;;  %v186_v38 = vld [vmem:[#allocation7 + $0x58] sm:$0xff]  ;;  %v559_v39 = vpack.c.bf16 %v94_v35, %v93_v34  ;;  %v95_v40 = vld [vmem:[#allocation5 + $0x70] sm:$0xff]  ;;  %v187_v43 = vld [vmem:[#allocation7 + $0x60] sm:$0xff] }
  0x53   :  { %569 = vmatpush3.bf16.msra.mxu1 %v568_v18  ;;  %v96_v41 = vld [vmem:[#allocation5 + $0x78] sm:$0xff]  ;;  %v580_v42 = vpack.c.bf16 %v186_v38, %v185_v37  ;;  %v188_v44 = vld [vmem:[#allocation7 + $0x68] sm:$0xff]  ;;  %v189_v48 = vld [vmem:[#allocation7 + $0x70] sm:$0xff] }
  0x54   :  { %570 = vmatprep.subr.bf16.mxu1 %v746_v0  ;;  %v562_v45 = vpack.c.bf16 %v96_v41, %v95_v40  ;;  %v583_v46 = vpack.c.bf16 %v188_v44, %v187_v43  ;;  %v80_v47 = vld [vmem:[#allocation2] sm:$0xff]  ;;  %v269_v51 = vld [vmem:[#allocation8] sm:$0xff]  ;;  %v270_v52 = vld [vmem:[#allocation8 + $0x8] sm:$0xff] }
  0x55   :  { %548 = vmatpush3.bf16.msra.mxu0 %v547_v14  ;;  %v190_v49 = vld [vmem:[#allocation7 + $0x78] sm:$0xff]  ;;  %v271_v53 = vld [vmem:[#allocation8 + $0x10] sm:$0xff]  ;;  %v589_v54 = vpack.c.bf16 %v270_v52, %v269_v51  ;;  %v273_v57 = vld [vmem:[#allocation8 + $0x20] sm:$0xff] }
  0x56   :  { %549 = vmatprep.subr.bf16.mxu0 %v746_v0  ;;  %v586_v50 = vpack.c.bf16 %v190_v49, %v189_v48  ;;  %v272_v55 = vld [vmem:[#allocation8 + $0x18] sm:$0xff]  ;;  %v274_v58 = vld [vmem:[#allocation8 + $0x28] sm:$0xff]  ;;  %v275_v60 = vld [vmem:[#allocation8 + $0x30] sm:$0xff] }
  0x57   :  { %572 = vmatpush3.bf16.msra.mxu1 %v571_v24  ;;  %v592_v56 = vpack.c.bf16 %v272_v55, %v271_v53  ;;  %v595_v59 = vpack.c.bf16 %v274_v58, %v273_v57  ;;  %v276_v61 = vld [vmem:[#allocation8 + $0x38] sm:$0xff]  ;;  %v277_v63 = vld [vmem:[#allocation8 + $0x40] sm:$0xff]  ;;  %v279_v3 = vld [vmem:[#allocation8 + $0x50] sm:$0xff] }
  0x58   :  { %573 = vmatprep.subr.bf16.mxu1 %v746_v0  ;;  %v598_v62 = vpack.c.bf16 %v276_v61, %v275_v60  ;;  %v280_v4 = vld [vmem:[#allocation8 + $0x58] sm:$0xff]  ;;  %v281_v6 = vld [vmem:[#allocation8 + $0x60] sm:$0xff]  ;;  %v282_v7 = vld [vmem:[#allocation8 + $0x68] sm:$0xff] }
  0x59   :  { %551 = vmatpush3.bf16.msra.mxu0 %v550_v21  ;;  %v604_v5 = vpack.c.bf16 %v280_v4, %v279_v3  ;;  %v607_v8 = vpack.c.bf16 %v282_v7, %v281_v6  ;;  %v381_v9 = vld [vmem:[%s900_s2] ss:$0 sm:$0xff]  ;;  %v283_v14 = vld [vmem:[#allocation8 + $0x70] sm:$0xff] }
  0x5a   :  { %552 = vmatprep.subr.bf16.mxu0 %v746_v0  ;;  %v284_v15 = vld [vmem:[#allocation8 + $0x78] sm:$0xff] }
  0x5b   :  { %575 = vmatpush3.bf16.msra.mxu1 %v574_v30  ;;  %v610_v16 = vpack.c.bf16 %v284_v15, %v283_v14  ;;  %v382_v17 = vld [vmem:[%s902_s4] ss:$0 sm:$0xff] }
  0x5c   :  { %576 = vmatprep.subr.bf16.mxu1 %v746_v0  ;;  %v383_v21 = vld [vmem:[%s904_s6] ss:$0 sm:$0xff] }
  0x5d   :  { %554 = vmatpush3.bf16.msra.mxu0 %v553_v27 }
  0x5e   :  { %555 = vmatprep.subr.bf16.mxu0 %v746_v0 }
  0x5f   :  { %578 = vmatpush3.bf16.msra.mxu1 %v577_v36 }
  0x60   :  { %579 = vmatprep.subr.bf16.mxu1 %v746_v0 }
  0x61   :  { %557 = vmatpush3.bf16.msra.mxu0 %v556_v33 }
  0x62   :  { %558 = vmatprep.subr.bf16.mxu0 %v746_v0 }
  0x63   :  { %581 = vmatpush3.bf16.msra.mxu1 %v580_v42 }
  0x64   :  { %582 = vmatprep.subr.bf16.mxu1 %v746_v0 }
  0x65   :  { %560 = vmatpush3.bf16.msra.mxu0 %v559_v39 }
  0x66   :  { %561 = vmatprep.subr.bf16.mxu0 %v746_v0 }
  0x67   :  { %584 = vmatpush3.bf16.msra.mxu1 %v583_v46 }
  0x68   :  { %585 = vmatprep.subr.bf16.mxu1 %v746_v0 }
  0x69   :  { %563 = vmatpush3.bf16.msra.mxu0 %v562_v45 }
  0x6a   :  { %588 = vmatprep.subr.bf16.mxu0 %v746_v0 }
  0x6b   :  { %587 = vmatpush3.bf16.msra.mxu1 %v586_v50 }
  0x6c   :  { %468 = vmatmul.mubr.f32.vlgmr.msra.gmra.mrb[0].mxu0 %v80_v47 }
  0x6d   :  { %537 = vmatprep.mubr.msk.f32.mxu0 %vm747_vm0, %v748_v1  ;;  %590 = vmatpush3.bf16.msra.mxu0 %v589_v54  ;;  %v278_v1 = vld [vmem:[#allocation8 + $0x48] sm:$0xff] }
  0x6e   :  { %591 = vmatprep.subr.bf16.mxu0 %v746_v0  ;;  %v601_v2 = vpack.c.bf16 %v278_v1, %v277_v63 }
  0x71   :  { %593 = vmatpush3.bf16.msra.mxu0 %v592_v56 }
  0x72   :  { %594 = vmatprep.subr.bf16.mxu0 %v746_v0 }
  0x75   :  { %596 = vmatpush3.bf16.msra.mxu0 %v595_v59 }
  0x76   :  { %597 = vmatprep.subr.bf16.mxu0 %v746_v0 }
  0x79   :  { %599 = vmatpush3.bf16.msra.mxu0 %v598_v62 }
  0x7a   :  { %600 = vmatprep.subr.bf16.mxu0 %v746_v0 }
  0x7d   :  { %602 = vmatpush3.bf16.msra.mxu0 %v601_v2 }
  0x7e   :  { %603 = vmatprep.subr.bf16.mxu0 %v746_v0 }
  0x81   :  { %605 = vmatpush3.bf16.msra.mxu0 %v604_v5 }
  0x82   :  { %606 = vmatprep.subr.bf16.mxu0 %v746_v0 }
  0x85   :  { %608 = vmatpush3.bf16.msra.mxu0 %v607_v8 }
  0x86   :  { %609 = vmatprep.subr.bf16.mxu0 %v746_v0 }
  0x89   :  { %611 = vmatpush3.bf16.msra.mxu0 %v610_v16 }
 0x13f   :  { %v170_v10 = vpop.f32.mrb[0].mxu0 }
 0x140   :  { %v171_v11 = vadd.f32 %v381_v9, %v170_v10  ;;  %v469_v12 = vpop.f32.mrb[1].mxu0 }
 0x142   :  { %v174_v13 = vmax.f32 %v171_v11, 0.0 }
 0x144   :  { %503 = vmatmul.mubr.f32.vlgmr.msra.gmra.mrb[0].mxu1 %v174_v13 }
 0x217   :  { %v264_v18 = vpop.f32.mrb[0].mxu1 }
 0x218   :  { %v265_v19 = vadd.f32 %v382_v17, %v264_v18  ;;  %v504_v0 = vpop.f32.mrb[1].mxu1 }
 0x21a   :  { %v268_v20 = vmax.f32 %v265_v19, 0.0 }
 0x21c   :  { %538 = vmatmul.mubr.f32.vlgmr.msra.gmra.mrb[2].mxu0 %v268_v20 }
 0x2ef   :  { %v358_v22 = vpop.f32.mrb[2].mxu0 }
 0x2f0   :  { %v359_v23 = vadd.f32 %v383_v21, %v358_v22  ;;  %v539_v24 = vpop.f32.mrb[3].mxu0 }
 0x2f2   :  { %v362_v25 = vmax.f32 %v359_v23, 0.0 }
 0x2f4   :  { %363 = vst [vmem:[#allocation10] sm:$0xff] %v362_v25 }
 0x2f5   :  { %721 = shalt.err (!%p718_p8)
}
 0x2f6   :  { %s722_s9 = scalar_lea.hbm %s905_s7, 128 }
 0x2f7   :  { %p723_p9 = scmp.ne.s32.totalorder %s905_s7, %s722_s9  ;;  %p726_p10 = scmp.lt.u32.totalorder %s722_s9, %s905_s7 }
 0x2f9   :  { %p728_p11 = pnand %p726_p10, %p723_p9 }
 0x2fb   :  { %731 = shalt.err (!%p728_p11)
}
 0x2fc   :  { %373 = dma.vmem_to_hbm [thread:$0]  %s371_s29, 128, %s905_s7, [#allocation4]  }
 0x2fd   :  { %738 = dma.done.wait [#allocation4], 128  }
 0x2fe   :  { %739 = vsyncadd [#allocation4], 4294967168 }
 0x2ff   :  { %377 = vsyncpa [#allocation3], 1 }
 0x300   :  { %378 = vsyncpa [#allocation6], 1 }
 0x301   :  { %379 = vsyncpa [#allocation9], 1 }
 0x302   :  { %380 = vsyncpa [#allocation4], 1 }

</bundles_post_ra>
